<compile_context>
chip_gen: v7x
topology: tpu7x:2x2x1
jax: 0.10.0
libtpu: 0.0.40
codegen_flags: <defaults>
</compile_context>

<pallas_src>
import functools

import jax
import jax.numpy as jnp
from jax.experimental import pallas as pl
from jax.experimental.pallas import tpu as pltpu

VMEM_SPEC = pl.BlockSpec(memory_space=pltpu.MemorySpace.VMEM)
EPS = 1e-5


# ---------------------------------------------------------------------------
# Single fused Pallas kernel: graph prep + whole Model.forward
# ---------------------------------------------------------------------------
def _fused_forward_kernel(
    src_ref, dst_ref, xin_ref, hall_ref, zmask_ref,
    wbig_ref, gb1_ref, gw2_ref, gb2_ref, gw3_ref, gb3_ref,
    b1_ref, g1_ref, be1_ref,
    w2_ref, b2_ref, g2_ref, be2_ref,
    w3_ref, b3_ref,
    o_ref,
    *, n, h1, h2, e):
    f32 = jnp.float32

    # ---------------- adjacency built in-kernel from the edge list ----------------
    # one-hot "scatter" = two iota compares + one [N,E]x[E,N] MXU matmul;
    # min(.,1) preserves the duplicate-edge dedup of .at[dst,src].set(1.0).
    src = src_ref[...]                                                       # [E, 1] i32
    dst = dst_ref[...]                                                       # [1, E] i32
    sr = (jax.lax.broadcasted_iota(jnp.int32, (e, n), 1) == src).astype(f32)  # [E, N]
    ds = (jax.lax.broadcasted_iota(jnp.int32, (n, e), 0) == dst).astype(f32)  # [N, E]
    a_cnt = jnp.dot(ds, sr, preferred_element_type=f32)                      # [N, N]
    rows = jax.lax.broadcasted_iota(jnp.int32, (n, n), 0)
    cols = jax.lax.broadcasted_iota(jnp.int32, (n, n), 1)
    eye = (rows == cols).astype(f32)
    adj = jnp.minimum(a_cnt, 1.0) + eye                                      # A + I
    deg = jnp.sum(adj, axis=1, keepdims=True)                                # [N,1], >=1
    d_inv = jax.lax.rsqrt(deg)                                               # D^-1/2
    a_rs = d_inv * adj                                                       # rows scaled

    def a_hat_mul(y):
        # D^-1/2 (A+I) D^-1/2 @ y without materializing a [1,N] row vector:
        # (d ⊙rows A) @ (d ⊙rows y)
        return jnp.dot(a_rs, d_inv * y, preferred_element_type=f32)

    # ---------------- merged first projection (single matmul) ----------------
    proj = jnp.dot(xin_ref[...], wbig_ref[...], preferred_element_type=f32)  # [N, 9*h1]
    xw_all = proj[:, 0:4 * h1]               # x @ w1x_k   (branch-blocked, 128 lanes)
    wproj = proj[:, 4 * h1:8 * h1]           # walk @ w1w_k (branch-blocked, 128 lanes)
    gcn1_pre = proj[:, 8 * h1:9 * h1]        # x @ gcn1_w

    # ---------------- GNN branch: 3 x relu(A_hat @ (X @ W) + b) ----------------
    g = jnp.maximum(a_hat_mul(gcn1_pre) + gb1_ref[...], 0.0)
    g = jnp.maximum(
        a_hat_mul(jnp.dot(g, gw2_ref[...], preferred_element_type=f32)) + gb2_ref[...],
        0.0)
    gnn_out = jnp.maximum(
        a_hat_mul(jnp.dot(g, gw3_ref[...], preferred_element_type=f32)) + gb3_ref[...],
        0.0)

    # ---------------- Subgraph branch -----------------------------------------
    # Block-diagonal operand Z[kN:(k+1)N, kH1:(k+1)H1] = x @ w1x_k, so the single
    # lane-dense matmul [I|hop1|hop2|hop3] @ Z gives hop_k @ (x @ w1x_k) in column
    # block k (hop_0 = I handled by the identity block of hall).
    tiled = jnp.concatenate([xw_all, xw_all, xw_all, xw_all], axis=0)        # [4N, 4H1]
    z = tiled * zmask_ref[...]
    hcat = jnp.dot(hall_ref[...], z, preferred_element_type=f32) + wproj + b1_ref[...]

    inv_n = 1.0 / n

    def bn_relu(v, gamma, beta):
        # training-mode BN (biased variance), one-pass stats: var = E[x^2]-mean^2
        mean = jnp.sum(v, axis=0, keepdims=True) * inv_n
        var = jnp.sum(v * v, axis=0, keepdims=True) * inv_n - mean * mean
        scale = gamma * jax.lax.rsqrt(jnp.maximum(var, 0.0) + EPS)
        return jnp.maximum(v * scale + (beta - mean * scale), 0.0)

    hcat = bn_relu(hcat, g1_ref[...], be1_ref[...])
    hcat = bn_relu(
        jnp.dot(hcat, w2_ref[...], preferred_element_type=f32) + b2_ref[...],
        g2_ref[...], be2_ref[...])
    # Linear3: vertically-stacked [4*H2, H2] weight + summed bias folds the
    # 4-branch sum directly into the matmul (no slice-adds, lane-contiguous result).
    sub_out = jnp.dot(hcat, w3_ref[...], preferred_element_type=f32) + b3_ref[...]

    # single store of the [N, 2*H2] output
    o_ref[...] = jnp.concatenate([gnn_out, sub_out], axis=1)


def fused_forward(packed, src_col, dst_row, xin, hall, zmask, hidden1, hidden2):
    n = xin.shape[0]
    e = src_col.shape[0]
    kernel = functools.partial(_fused_forward_kernel, n=n, h1=hidden1, h2=hidden2, e=e)
    return pl.pallas_call(
        kernel,
        out_shape=jax.ShapeDtypeStruct((n, 2 * hidden2), jnp.float32),
        in_specs=[VMEM_SPEC] * 20,
        out_specs=VMEM_SPEC,
    )(src_col, dst_row, xin, hall, zmask,
      packed["wbig"], packed["gcn1_b"],
      packed["gcn2_w"], packed["gcn2_b"],
      packed["gcn3_w"], packed["gcn3_b"],
      packed["b1"], packed["g1"], packed["be1"],
      packed["w2"], packed["b2"], packed["g2"], packed["be2"],
      packed["w3"], packed["b3"])


# ---------------------------------------------------------------------------
# Parameter initialization (deterministic, synthetic) + packing for the kernel
# ---------------------------------------------------------------------------
def _init_linear(key, f_in, f_out, scale=0.1):
    kw, kb = jax.random.split(key)
    w = scale * jax.random.normal(kw, (f_in, f_out), dtype=jnp.float32)
    b = scale * jax.random.normal(kb, (1, f_out), dtype=jnp.float32)
    return w, b


def init_params(key, in_dim, hidden1, hidden2, walk_dim):
    keys = jax.random.split(key, 16)
    params = {}
    # GCN stack: in -> h1 -> h2 -> h2
    params["gcn1_w"], params["gcn1_b"] = _init_linear(keys[0], in_dim, hidden1)
    params["gcn2_w"], params["gcn2_b"] = _init_linear(keys[1], hidden1, hidden2)
    params["gcn3_w"], params["gcn3_b"] = _init_linear(keys[2], hidden2, hidden2)
    # Subgraph branches (4 identical-shaped MLPs, distinct weights)
    sub_in = in_dim + walk_dim
    for k in range(4):
        base = 3 + 3 * k
        w1, b1 = _init_linear(keys[base + 0], sub_in, hidden1)
        w2, b2 = _init_linear(keys[base + 1], hidden1, hidden2)
        w3, b3 = _init_linear(keys[base + 2], hidden2, hidden2)
        params[f"sub{k}"] = {
            "w1": w1, "b1": b1,
            "g1": jnp.ones((1, hidden1), jnp.float32),
            "be1": jnp.zeros((1, hidden1), jnp.float32),
            "w2": w2, "b2": b2,
            "g2": jnp.ones((1, hidden2), jnp.float32),
            "be2": jnp.zeros((1, hidden2), jnp.float32),
            "w3": w3, "b3": b3,
        }
    # TODO(synk): cls_head (Linear(hidden2*2, num_classes)) is defined in __init__
    # but never used in Model.forward, so it is not applied here either.
    return params


def _block_diag(mats):
    rows = sum(m.shape[0] for m in mats)
    cols = sum(m.shape[1] for m in mats)
    out = jnp.zeros((rows, cols), jnp.float32)
    r = c = 0
    for m in mats:
        out = out.at[r:r + m.shape[0], c:c + m.shape[1]].set(m)
        r += m.shape[0]
        c += m.shape[1]
    return out


def pack_params(params, in_dim, walk_dim, hidden1, hidden2):
    """One-time packing of the 4 subgraph branches + GCN1 into lane-dense slabs."""
    h1 = hidden1
    packed = {k: params[k] for k in
              ("gcn1_b", "gcn2_w", "gcn2_b", "gcn3_w", "gcn3_b")}
    subs = [params[f"sub{k}"] for k in range(4)]
    pad = (-(in_dim + walk_dim)) % 8
    xin_dim = in_dim + walk_dim + pad
    # Merged first-projection weight: [ w1x (4*h1) | w1w (4*h1) | gcn1_w (h1) ]
    w1x = jnp.concatenate([s["w1"][:in_dim] for s in subs], axis=1)       # [in, 4h1]
    w1w = jnp.concatenate([s["w1"][in_dim:] for s in subs], axis=1)       # [walk, 4h1]
    wbig = jnp.zeros((xin_dim, 8 * h1 + h1), jnp.float32)
    wbig = wbig.at[:in_dim, 0:4 * h1].set(w1x)
    wbig = wbig.at[in_dim:in_dim + walk_dim, 4 * h1:8 * h1].set(w1w)
    wbig = wbig.at[:in_dim, 8 * h1:8 * h1 + h1].set(params["gcn1_w"])
    packed["wbig"] = wbig
    packed["b1"] = jnp.concatenate([s["b1"] for s in subs], axis=1)
    packed["g1"] = jnp.concatenate([s["g1"] for s in subs], axis=1)
    packed["be1"] = jnp.concatenate([s["be1"] for s in subs], axis=1)
    packed["w2"] = _block_diag([s["w2"] for s in subs])                   # [4h1, 4h2]
    packed["b2"] = jnp.concatenate([s["b2"] for s in subs], axis=1)
    packed["g2"] = jnp.concatenate([s["g2"] for s in subs], axis=1)
    packed["be2"] = jnp.concatenate([s["be2"] for s in subs], axis=1)
    packed["w3"] = jnp.concatenate([s["w3"] for s in subs], axis=0)       # [4h2, h2]
    packed["b3"] = sum(s["b3"] for s in subs)                             # summed bias
    return packed


# ---------------------------------------------------------------------------
# Model forward: one-time input packing + ONE fused Pallas kernel
# ---------------------------------------------------------------------------
def model_forward(packed, x, edge_index, walk_feats, hop1, hop2, hop3,
                  walk_order, hidden1, hidden2):
    n, in_dim = x.shape
    # --- one-time input packing (fused by XLA into a single tiny prep step) ---
    src_col = edge_index[0].astype(jnp.int32)[:, None]        # [E, 1]
    dst_row = edge_index[1].astype(jnp.int32)[None, :]        # [1, E]
    walk = walk_feats[:, :walk_order].astype(jnp.float32)
    pad = (-(in_dim + walk_order)) % 8
    pieces = [x.astype(jnp.float32), walk]
    if pad:
        pieces.append(jnp.zeros((n, pad), jnp.float32))
    xin = jnp.concatenate(pieces, axis=1)                      # [N, in+walk+pad]
    hall = jnp.concatenate(                                    # [N, 4N] lane-dense hops
        [jnp.eye(n, dtype=jnp.float32), hop1, hop2, hop3], axis=1)
    zmask = jnp.kron(jnp.eye(4, dtype=jnp.float32),            # [4N, 4H1] block selector
                     jnp.ones((n, hidden1), jnp.float32))
    return fused_forward(packed, src_col, dst_row, xin, hall, zmask, hidden1, hidden2)


# ---------------------------------------------------------------------------
# Main
# ---------------------------------------------------------------------------
if __name__ == "__main__":
    N = 32            # number of nodes
    IN_DIM = 16
    HIDDEN1 = 32
    HIDDEN2 = 32
    WALK_DIM = 5      # random_walk_dim
    E = 64            # number of edges

    key = jax.random.PRNGKey(0)
    k_x, k_e, k_w, k_h1, k_h2, k_h3, k_p = jax.random.split(key, 7)

    x = jax.random.normal(k_x, (N, IN_DIM), dtype=jnp.float32)
    edge_index = jax.random.randint(k_e, (2, E), 0, N, dtype=jnp.int32)
    walk_feats = jax.random.normal(k_w, (N, 8), dtype=jnp.float32)   # sliced to [:, :5]
    hop1 = (jax.random.uniform(k_h1, (N, N)) < 0.2).astype(jnp.float32)
    hop2 = (jax.random.uniform(k_h2, (N, N)) < 0.2).astype(jnp.float32)
    hop3 = (jax.random.uniform(k_h3, (N, N)) < 0.2).astype(jnp.float32)

    params = init_params(k_p, IN_DIM, HIDDEN1, HIDDEN2, WALK_DIM)
    packed = pack_params(params, IN_DIM, WALK_DIM, HIDDEN1, HIDDEN2)

    fwd = jax.jit(functools.partial(
        model_forward, walk_order=WALK_DIM, hidden1=HIDDEN1, hidden2=HIDDEN2))
    out = fwd(packed, x, edge_index, walk_feats, hop1, hop2, hop3)
    out = jax.block_until_ready(out)

    assert out.shape == (N, HIDDEN2 * 2), out.shape
    assert jnp.all(jnp.isfinite(out))
    print("KERNEL_OK")
</pallas_src>

<mosaic_0001>
module attributes {stable_mosaic.version = 11 : i64} {
  func.func @_fused_forward_kernel(%arg0: memref<64x1xi32, #tpu.memory_space<vmem>>, %arg1: memref<1x64xi32, #tpu.memory_space<vmem>>, %arg2: memref<32x24xf32, #tpu.memory_space<vmem>>, %arg3: memref<32x128xf32, #tpu.memory_space<vmem>>, %arg4: memref<128x128xf32, #tpu.memory_space<vmem>>, %arg5: memref<24x288xf32, #tpu.memory_space<vmem>>, %arg6: memref<1x32xf32, #tpu.memory_space<vmem>>, %arg7: memref<32x32xf32, #tpu.memory_space<vmem>>, %arg8: memref<1x32xf32, #tpu.memory_space<vmem>>, %arg9: memref<32x32xf32, #tpu.memory_space<vmem>>, %arg10: memref<1x32xf32, #tpu.memory_space<vmem>>, %arg11: memref<1x128xf32, #tpu.memory_space<vmem>>, %arg12: memref<1x128xf32, #tpu.memory_space<vmem>>, %arg13: memref<1x128xf32, #tpu.memory_space<vmem>>, %arg14: memref<128x128xf32, #tpu.memory_space<vmem>>, %arg15: memref<1x128xf32, #tpu.memory_space<vmem>>, %arg16: memref<1x128xf32, #tpu.memory_space<vmem>>, %arg17: memref<1x128xf32, #tpu.memory_space<vmem>>, %arg18: memref<128x32xf32, #tpu.memory_space<vmem>>, %arg19: memref<1x32xf32, #tpu.memory_space<vmem>>, %arg20: memref<32x64xf32, #tpu.memory_space<vmem>>) attributes {dimension_semantics = [], scalar_prefetch = 0 : i64, scratch_operands = 0 : i64, tpu.core_type = #tpu.core_type<tc>} {
    %c0 = arith.constant 0 : index
    %c0_0 = arith.constant 0 : index
    %0 = vector.load %arg0[%c0, %c0_0] : memref<64x1xi32, #tpu.memory_space<vmem>>, vector<64x1xi32>
    %c0_1 = arith.constant 0 : index
    %c0_2 = arith.constant 0 : index
    %1 = vector.load %arg1[%c0_1, %c0_2] : memref<1x64xi32, #tpu.memory_space<vmem>>, vector<1x64xi32>
    %2 = tpu.iota {dimensions = array<i32: 1>} : vector<64x32xi32>
    %3 = vector.broadcast %0 : vector<64x1xi32> to vector<64x32xi32>
    %4 = arith.cmpi eq, %2, %3 : vector<64x32xi32>
    %5 = arith.extui %4 : vector<64x32xi1> to vector<64x32xi32>
    %6 = arith.sitofp %5 : vector<64x32xi32> to vector<64x32xf32>
    %7 = tpu.iota {dimensions = array<i32: 0>} : vector<32x64xi32>
    %8 = vector.broadcast %1 : vector<1x64xi32> to vector<32x64xi32>
    %9 = arith.cmpi eq, %7, %8 : vector<32x64xi32>
    %10 = arith.extui %9 : vector<32x64xi1> to vector<32x64xi32>
    %11 = arith.sitofp %10 : vector<32x64xi32> to vector<32x64xf32>
    %cst = arith.constant dense<0.000000e+00> : vector<32x32xf32>
    %12 = tpu.matmul %11, %6, %cst {dimension_numbers = #tpu.dot_dimension_numbers<[1], [0], [0], [1], [0, 0, 1, 1], [], []>} : vector<32x64xf32>, vector<64x32xf32>, vector<32x32xf32> -> vector<32x32xf32>
    %13 = tpu.iota {dimensions = array<i32: 0>} : vector<32x32xi32>
    %14 = tpu.iota {dimensions = array<i32: 1>} : vector<32x32xi32>
    %15 = arith.cmpi eq, %13, %14 : vector<32x32xi32>
    %16 = arith.extui %15 : vector<32x32xi1> to vector<32x32xi32>
    %17 = arith.sitofp %16 : vector<32x32xi32> to vector<32x32xf32>
    %cst_3 = arith.constant 1.000000e+00 : f32
    %18 = vector.broadcast %cst_3 : f32 to vector<32x32xf32>
    %19 = arith.minimumf %12, %18 : vector<32x32xf32>
    %20 = arith.addf %19, %17 : vector<32x32xf32>
    %cst_4 = arith.constant dense<0.000000e+00> : vector<32xf32>
    %21 = vector.multi_reduction <add>, %20, %cst_4 [1] : vector<32x32xf32> to vector<32xf32>
    %22 = vector.shape_cast %21 : vector<32xf32> to vector<32x1xf32>
    %23 = math.rsqrt %22 : vector<32x1xf32>
    %24 = vector.broadcast %23 : vector<32x1xf32> to vector<32x32xf32>
    %25 = arith.mulf %24, %20 : vector<32x32xf32>
    %c0_5 = arith.constant 0 : index
    %c0_6 = arith.constant 0 : index
    %26 = vector.load %arg2[%c0_5, %c0_6] : memref<32x24xf32, #tpu.memory_space<vmem>>, vector<32x24xf32>
    %c0_7 = arith.constant 0 : index
    %c0_8 = arith.constant 0 : index
    %27 = vector.load %arg5[%c0_7, %c0_8] : memref<24x288xf32, #tpu.memory_space<vmem>>, vector<24x288xf32>
    %cst_9 = arith.constant dense<0.000000e+00> : vector<32x288xf32>
    %28 = tpu.matmul %26, %27, %cst_9 {dimension_numbers = #tpu.dot_dimension_numbers<[1], [0], [0], [1], [0, 0, 1, 1], [], []>} : vector<32x24xf32>, vector<24x288xf32>, vector<32x288xf32> -> vector<32x288xf32>
    %29 = vector.extract_strided_slice %28 {offsets = [0, 0], sizes = [32, 128], strides = [1, 1]} : vector<32x288xf32> to vector<32x128xf32>
    %30 = vector.extract_strided_slice %28 {offsets = [0, 128], sizes = [32, 128], strides = [1, 1]} : vector<32x288xf32> to vector<32x128xf32>
    %31 = vector.extract_strided_slice %28 {offsets = [0, 256], sizes = [32, 32], strides = [1, 1]} : vector<32x288xf32> to vector<32x32xf32>
    %32 = vector.broadcast %23 : vector<32x1xf32> to vector<32x32xf32>
    %33 = arith.mulf %32, %31 : vector<32x32xf32>
    %cst_10 = arith.constant dense<0.000000e+00> : vector<32x32xf32>
    %34 = tpu.matmul %25, %33, %cst_10 {dimension_numbers = #tpu.dot_dimension_numbers<[1], [0], [0], [1], [0, 0, 1, 1], [], []>} : vector<32x32xf32>, vector<32x32xf32>, vector<32x32xf32> -> vector<32x32xf32>
    %c0_11 = arith.constant 0 : index
    %c0_12 = arith.constant 0 : index
    %35 = vector.load %arg6[%c0_11, %c0_12] : memref<1x32xf32, #tpu.memory_space<vmem>>, vector<1x32xf32>
    %36 = vector.broadcast %35 : vector<1x32xf32> to vector<32x32xf32>
    %37 = arith.addf %34, %36 : vector<32x32xf32>
    %cst_13 = arith.constant 0.000000e+00 : f32
    %38 = vector.broadcast %cst_13 : f32 to vector<32x32xf32>
    %39 = arith.maximumf %37, %38 : vector<32x32xf32>
    %c0_14 = arith.constant 0 : index
    %c0_15 = arith.constant 0 : index
    %40 = vector.load %arg7[%c0_14, %c0_15] : memref<32x32xf32, #tpu.memory_space<vmem>>, vector<32x32xf32>
    %cst_16 = arith.constant dense<0.000000e+00> : vector<32x32xf32>
    %41 = tpu.matmul %39, %40, %cst_16 {dimension_numbers = #tpu.dot_dimension_numbers<[1], [0], [0], [1], [0, 0, 1, 1], [], []>} : vector<32x32xf32>, vector<32x32xf32>, vector<32x32xf32> -> vector<32x32xf32>
    %42 = vector.broadcast %23 : vector<32x1xf32> to vector<32x32xf32>
    %43 = arith.mulf %42, %41 : vector<32x32xf32>
    %cst_17 = arith.constant dense<0.000000e+00> : vector<32x32xf32>
    %44 = tpu.matmul %25, %43, %cst_17 {dimension_numbers = #tpu.dot_dimension_numbers<[1], [0], [0], [1], [0, 0, 1, 1], [], []>} : vector<32x32xf32>, vector<32x32xf32>, vector<32x32xf32> -> vector<32x32xf32>
    %c0_18 = arith.constant 0 : index
    %c0_19 = arith.constant 0 : index
    %45 = vector.load %arg8[%c0_18, %c0_19] : memref<1x32xf32, #tpu.memory_space<vmem>>, vector<1x32xf32>
    %46 = vector.broadcast %45 : vector<1x32xf32> to vector<32x32xf32>
    %47 = arith.addf %44, %46 : vector<32x32xf32>
    %cst_20 = arith.constant 0.000000e+00 : f32
    %48 = vector.broadcast %cst_20 : f32 to vector<32x32xf32>
    %49 = arith.maximumf %47, %48 : vector<32x32xf32>
    %c0_21 = arith.constant 0 : index
    %c0_22 = arith.constant 0 : index
    %50 = vector.load %arg9[%c0_21, %c0_22] : memref<32x32xf32, #tpu.memory_space<vmem>>, vector<32x32xf32>
    %cst_23 = arith.constant dense<0.000000e+00> : vector<32x32xf32>
    %51 = tpu.matmul %49, %50, %cst_23 {dimension_numbers = #tpu.dot_dimension_numbers<[1], [0], [0], [1], [0, 0, 1, 1], [], []>} : vector<32x32xf32>, vector<32x32xf32>, vector<32x32xf32> -> vector<32x32xf32>
    %52 = vector.broadcast %23 : vector<32x1xf32> to vector<32x32xf32>
    %53 = arith.mulf %52, %51 : vector<32x32xf32>
    %cst_24 = arith.constant dense<0.000000e+00> : vector<32x32xf32>
    %54 = tpu.matmul %25, %53, %cst_24 {dimension_numbers = #tpu.dot_dimension_numbers<[1], [0], [0], [1], [0, 0, 1, 1], [], []>} : vector<32x32xf32>, vector<32x32xf32>, vector<32x32xf32> -> vector<32x32xf32>
    %c0_25 = arith.constant 0 : index
    %c0_26 = arith.constant 0 : index
    %55 = vector.load %arg10[%c0_25, %c0_26] : memref<1x32xf32, #tpu.memory_space<vmem>>, vector<1x32xf32>
    %56 = vector.broadcast %55 : vector<1x32xf32> to vector<32x32xf32>
    %57 = arith.addf %54, %56 : vector<32x32xf32>
    %cst_27 = arith.constant 0.000000e+00 : f32
    %58 = vector.broadcast %cst_27 : f32 to vector<32x32xf32>
    %59 = arith.maximumf %57, %58 : vector<32x32xf32>
    %60 = tpu.concatenate %29, %29, %29, %29 in 0 : vector<32x128xf32>, vector<32x128xf32>, vector<32x128xf32>, vector<32x128xf32> -> vector<128x128xf32>
    %c0_28 = arith.constant 0 : index
    %c0_29 = arith.constant 0 : index
    %61 = vector.load %arg4[%c0_28, %c0_29] : memref<128x128xf32, #tpu.memory_space<vmem>>, vector<128x128xf32>
    %62 = arith.mulf %60, %61 : vector<128x128xf32>
    %c0_30 = arith.constant 0 : index
    %c0_31 = arith.constant 0 : index
    %63 = vector.load %arg3[%c0_30, %c0_31] : memref<32x128xf32, #tpu.memory_space<vmem>>, vector<32x128xf32>
    %cst_32 = arith.constant dense<0.000000e+00> : vector<32x128xf32>
    %64 = tpu.matmul %63, %62, %cst_32 {dimension_numbers = #tpu.dot_dimension_numbers<[1], [0], [0], [1], [0, 0, 1, 1], [], []>} : vector<32x128xf32>, vector<128x128xf32>, vector<32x128xf32> -> vector<32x128xf32>
    %65 = arith.addf %64, %30 : vector<32x128xf32>
    %c0_33 = arith.constant 0 : index
    %c0_34 = arith.constant 0 : index
    %66 = vector.load %arg11[%c0_33, %c0_34] : memref<1x128xf32, #tpu.memory_space<vmem>>, vector<1x128xf32>
    %67 = vector.broadcast %66 : vector<1x128xf32> to vector<32x128xf32>
    %68 = arith.addf %65, %67 : vector<32x128xf32>
    %c0_35 = arith.constant 0 : index
    %c0_36 = arith.constant 0 : index
    %69 = vector.load %arg12[%c0_35, %c0_36] : memref<1x128xf32, #tpu.memory_space<vmem>>, vector<1x128xf32>
    %c0_37 = arith.constant 0 : index
    %c0_38 = arith.constant 0 : index
    %70 = vector.load %arg13[%c0_37, %c0_38] : memref<1x128xf32, #tpu.memory_space<vmem>>, vector<1x128xf32>
    %cst_39 = arith.constant dense<0.000000e+00> : vector<128xf32>
    %71 = vector.multi_reduction <add>, %68, %cst_39 [0] : vector<32x128xf32> to vector<128xf32>
    %72 = vector.shape_cast %71 : vector<128xf32> to vector<1x128xf32>
    %cst_40 = arith.constant 3.125000e-02 : f32
    %73 = vector.broadcast %cst_40 : f32 to vector<1x128xf32>
    %74 = arith.mulf %72, %73 : vector<1x128xf32>
    %75 = arith.mulf %68, %68 : vector<32x128xf32>
    %cst_41 = arith.constant dense<0.000000e+00> : vector<128xf32>
    %76 = vector.multi_reduction <add>, %75, %cst_41 [0] : vector<32x128xf32> to vector<128xf32>
    %77 = vector.shape_cast %76 : vector<128xf32> to vector<1x128xf32>
    %cst_42 = arith.constant 3.125000e-02 : f32
    %78 = vector.broadcast %cst_42 : f32 to vector<1x128xf32>
    %79 = arith.mulf %77, %78 : vector<1x128xf32>
    %80 = arith.mulf %74, %74 : vector<1x128xf32>
    %81 = arith.subf %79, %80 : vector<1x128xf32>
    %cst_43 = arith.constant 0.000000e+00 : f32
    %82 = vector.broadcast %cst_43 : f32 to vector<1x128xf32>
    %83 = arith.maximumf %81, %82 : vector<1x128xf32>
    %cst_44 = arith.constant 9.99999974E-6 : f32
    %84 = vector.broadcast %cst_44 : f32 to vector<1x128xf32>
    %85 = arith.addf %83, %84 : vector<1x128xf32>
    %86 = math.rsqrt %85 : vector<1x128xf32>
    %87 = arith.mulf %69, %86 : vector<1x128xf32>
    %88 = vector.broadcast %87 : vector<1x128xf32> to vector<32x128xf32>
    %89 = arith.mulf %68, %88 : vector<32x128xf32>
    %90 = arith.mulf %74, %87 : vector<1x128xf32>
    %91 = arith.subf %70, %90 : vector<1x128xf32>
    %92 = vector.broadcast %91 : vector<1x128xf32> to vector<32x128xf32>
    %93 = arith.addf %89, %92 : vector<32x128xf32>
    %cst_45 = arith.constant 0.000000e+00 : f32
    %94 = vector.broadcast %cst_45 : f32 to vector<32x128xf32>
    %95 = arith.maximumf %93, %94 : vector<32x128xf32>
    %c0_46 = arith.constant 0 : index
    %c0_47 = arith.constant 0 : index
    %96 = vector.load %arg14[%c0_46, %c0_47] : memref<128x128xf32, #tpu.memory_space<vmem>>, vector<128x128xf32>
    %cst_48 = arith.constant dense<0.000000e+00> : vector<32x128xf32>
    %97 = tpu.matmul %95, %96, %cst_48 {dimension_numbers = #tpu.dot_dimension_numbers<[1], [0], [0], [1], [0, 0, 1, 1], [], []>} : vector<32x128xf32>, vector<128x128xf32>, vector<32x128xf32> -> vector<32x128xf32>
    %c0_49 = arith.constant 0 : index
    %c0_50 = arith.constant 0 : index
    %98 = vector.load %arg15[%c0_49, %c0_50] : memref<1x128xf32, #tpu.memory_space<vmem>>, vector<1x128xf32>
    %99 = vector.broadcast %98 : vector<1x128xf32> to vector<32x128xf32>
    %100 = arith.addf %97, %99 : vector<32x128xf32>
    %c0_51 = arith.constant 0 : index
    %c0_52 = arith.constant 0 : index
    %101 = vector.load %arg16[%c0_51, %c0_52] : memref<1x128xf32, #tpu.memory_space<vmem>>, vector<1x128xf32>
    %c0_53 = arith.constant 0 : index
    %c0_54 = arith.constant 0 : index
    %102 = vector.load %arg17[%c0_53, %c0_54] : memref<1x128xf32, #tpu.memory_space<vmem>>, vector<1x128xf32>
    %cst_55 = arith.constant dense<0.000000e+00> : vector<128xf32>
    %103 = vector.multi_reduction <add>, %100, %cst_55 [0] : vector<32x128xf32> to vector<128xf32>
    %104 = vector.shape_cast %103 : vector<128xf32> to vector<1x128xf32>
    %cst_56 = arith.constant 3.125000e-02 : f32
    %105 = vector.broadcast %cst_56 : f32 to vector<1x128xf32>
    %106 = arith.mulf %104, %105 : vector<1x128xf32>
    %107 = arith.mulf %100, %100 : vector<32x128xf32>
    %cst_57 = arith.constant dense<0.000000e+00> : vector<128xf32>
    %108 = vector.multi_reduction <add>, %107, %cst_57 [0] : vector<32x128xf32> to vector<128xf32>
    %109 = vector.shape_cast %108 : vector<128xf32> to vector<1x128xf32>
    %cst_58 = arith.constant 3.125000e-02 : f32
    %110 = vector.broadcast %cst_58 : f32 to vector<1x128xf32>
    %111 = arith.mulf %109, %110 : vector<1x128xf32>
    %112 = arith.mulf %106, %106 : vector<1x128xf32>
    %113 = arith.subf %111, %112 : vector<1x128xf32>
    %cst_59 = arith.constant 0.000000e+00 : f32
    %114 = vector.broadcast %cst_59 : f32 to vector<1x128xf32>
    %115 = arith.maximumf %113, %114 : vector<1x128xf32>
    %cst_60 = arith.constant 9.99999974E-6 : f32
    %116 = vector.broadcast %cst_60 : f32 to vector<1x128xf32>
    %117 = arith.addf %115, %116 : vector<1x128xf32>
    %118 = math.rsqrt %117 : vector<1x128xf32>
    %119 = arith.mulf %101, %118 : vector<1x128xf32>
    %120 = vector.broadcast %119 : vector<1x128xf32> to vector<32x128xf32>
    %121 = arith.mulf %100, %120 : vector<32x128xf32>
    %122 = arith.mulf %106, %119 : vector<1x128xf32>
    %123 = arith.subf %102, %122 : vector<1x128xf32>
    %124 = vector.broadcast %123 : vector<1x128xf32> to vector<32x128xf32>
    %125 = arith.addf %121, %124 : vector<32x128xf32>
    %cst_61 = arith.constant 0.000000e+00 : f32
    %126 = vector.broadcast %cst_61 : f32 to vector<32x128xf32>
    %127 = arith.maximumf %125, %126 : vector<32x128xf32>
    %c0_62 = arith.constant 0 : index
    %c0_63 = arith.constant 0 : index
    %128 = vector.load %arg18[%c0_62, %c0_63] : memref<128x32xf32, #tpu.memory_space<vmem>>, vector<128x32xf32>
    %cst_64 = arith.constant dense<0.000000e+00> : vector<32x32xf32>
    %129 = tpu.matmul %127, %128, %cst_64 {dimension_numbers = #tpu.dot_dimension_numbers<[1], [0], [0], [1], [0, 0, 1, 1], [], []>} : vector<32x128xf32>, vector<128x32xf32>, vector<32x32xf32> -> vector<32x32xf32>
    %c0_65 = arith.constant 0 : index
    %c0_66 = arith.constant 0 : index
    %130 = vector.load %arg19[%c0_65, %c0_66] : memref<1x32xf32, #tpu.memory_space<vmem>>, vector<1x32xf32>
    %131 = vector.broadcast %130 : vector<1x32xf32> to vector<32x32xf32>
    %132 = arith.addf %129, %131 : vector<32x32xf32>
    %133 = tpu.concatenate %59, %132 in 1 : vector<32x32xf32>, vector<32x32xf32> -> vector<32x64xf32>
    %c0_67 = arith.constant 0 : index
    %c0_68 = arith.constant 0 : index
    %134 = vector.load %arg20[%c0_67, %c0_68] : memref<32x64xf32, #tpu.memory_space<vmem>>, vector<32x64xf32>
    tpu.vector_store %arg20[%c0_67, %c0_68], %133 {strides = array<i32>} : memref<32x64xf32, #tpu.memory_space<vmem>>, vector<32x64xf32>,
    return
  }
}

</mosaic_0001>

<bundles_post_ra>
// kernel: model_forward.1
= control target key start
LH: loop header
LB: loop body
LE: loop exit
PB: predicated region body
PF: predicated region fallthrough
CT: control target
= control target key end

     0   :  { %s2714_s0 = inlined_call_operand.vmem [shape: s32[64,1], index: 0, kind: input, shape index: {}]   ;;  %s2715_s1 = inlined_call_operand.vmem [shape: s32[1,64], index: 1, kind: input, shape index: {}]   ;;  %s2716_s2 = inlined_call_operand.vmem [shape: f32[32,24], index: 2, kind: input, shape index: {}]   ;;  %s2717_s3 = inlined_call_operand.vmem [shape: f32[32,128], index: 3, kind: input, shape index: {}]   ;;  %s2718_s4 = inlined_call_operand.vmem [shape: f32[128,128], index: 4, kind: input, shape index: {}]   ;;  %s2719_s5 = inlined_call_operand.vmem [shape: f32[24,288], index: 5, kind: input, shape index: {}]   ;;  %s2720_s6 = inlined_call_operand.vmem [shape: f32[1,32], index: 6, kind: input, shape index: {}]   ;;  %s2721_s7 = inlined_call_operand.vmem [shape: f32[32,32], index: 7, kind: input, shape index: {}]   ;;  %s2722_s8 = inlined_call_operand.vmem [shape: f32[1,32], index: 8, kind: input, shape index: {}]   ;;  %s2723_s9 = inlined_call_operand.vmem [shape: f32[32,32], index: 9, kind: input, shape index: {}]   ;;  %s2724_s10 = inlined_call_operand.vmem [shape: f32[1,32], index: 10, kind: input, shape index: {}]   ;;  %s2725_s11 = inlined_call_operand.vmem [shape: f32[1,128], index: 11, kind: input, shape index: {}]   ;;  %s2726_s12 = inlined_call_operand.vmem [shape: f32[1,128], index: 12, kind: input, shape index: {}]   ;;  %s2727_s13 = inlined_call_operand.vmem [shape: f32[1,128], index: 13, kind: input, shape index: {}]   ;;  %s2728_s14 = inlined_call_operand.vmem [shape: f32[128,128], index: 14, kind: input, shape index: {}]   ;;  %s2729_s15 = inlined_call_operand.vmem [shape: f32[1,128], index: 15, kind: input, shape index: {}]   ;;  %s2730_s16 = inlined_call_operand.vmem [shape: f32[1,128], index: 16, kind: input, shape index: {}]   ;;  %s2731_s17 = inlined_call_operand.vmem [shape: f32[1,128], index: 17, kind: input, shape index: {}]   ;;  %s2732_s18 = inlined_call_operand.vmem [shape: f32[128,32], index: 18, kind: input, shape index: {}]   ;;  %s2733_s19 = inlined_call_operand.vmem [shape: f32[1,32], index: 19, kind: input, shape index: {}]   ;;  %s2734_s20 = inlined_call_operand.hbm [shape: f32[32,64], index: 20, kind: output, shape index: {}]  }
   0x1   :  { %2739 = sst [smem:[#allocation5_spill]] %s2714_s0 }
   0x2   :  { %2740 = sst [smem:[#allocation6_spill]] %s2715_s1 }
   0x3   :  { %2741 = sst [smem:[#allocation7_spill]] %s2716_s2 }
   0x4   :  { %2742 = sst [smem:[#allocation8_spill]] %s2717_s3 }
   0x5   :  { %2743 = sst [smem:[#allocation9_spill]] %s2718_s4 }
   0x6   :  { %s2744_s23 = sld [smem:[#allocation5_spill]]  ;;  %v2108_v2 = vmov 0  }
   0x7   :  { %2071 = vset.pattern.permute.xlu1 %v2108_v2  ;;  %2070 = vset.pattern.permute.xlu0 %v2108_v2 }
   0xc   :  { %v68_v0 = vld [vmem:[%s2744_s23 + $0x10] sm:$0xff]  ;;  %v66_v1 = vld [vmem:[%s2744_s23] sm:$0xff] }
   0xd   :  { %84 = vperm.xlu1 %2071, %v68_v0   ;;  %78 = vperm.xlu0 %2070, %v66_v1  }
   0xe   :  { %25 = vsyncpa [#allocation3], 0  ;;  %v69_v3 = vld [vmem:[%s2744_s23 + $0x18] sm:$0xff]  ;;  %v67_v4 = vld [vmem:[%s2744_s23 + $0x8] sm:$0xff]  ;;  %v75_v9 = vlaneseq  ;;  %s2745_s25 = sld [smem:[#allocation6_spill]]  ;;  %vm146_vm1 = vcmask 523264  }
   0xf   :  { %v71_v5 = vld [vmem:[%s2744_s23 + $0x28] sm:$0xff]  ;;  %v70_v6 = vld [vmem:[%s2744_s23 + $0x20] sm:$0xff]  ;;  %v73_v7 = vld [vmem:[%s2744_s23 + $0x38] sm:$0xff]  ;;  %v2109_v12 = vmov 0.0   ;;  %vm298_vm2 = vcmask 195584   ;;  %s2746_s29 = sld [smem:[#allocation7_spill]] }
  0x10   :  { %v72_v8 = vld [vmem:[%s2744_s23 + $0x30] sm:$0xff]  ;;  %v2244_v10 = vshrl.u32 %v75_v9, 7  ;;  %v294_v15 = vld [vmem:[%s2719_s5 + $0x28] sm:$0xff]  ;;  %v297_v18 = vld [vmem:[%s2719_s5 + $0x40] sm:$0xff]  ;;  %v2292_v24 = vand.u32 127, %v75_v9  ;;  %s2747_s26 = sld [smem:[#allocation9_spill]] }
  0x11   :  { %87 = vperm.xlu1 %2071, %v69_v3   ;;  %81 = vperm.xlu0 %2070, %v67_v4   ;;  %v291_v14 = vld [vmem:[%s2719_s5 + $0x10] sm:$0xff]  ;;  %v2110_v27 = vmov 1.0|1.0   ;;  %v290_v38 = vld [vmem:[%s2719_s5 + $0x8] sm:$0xff]  ;;  %v293_v39 = vld [vmem:[%s2719_s5 + $0x20] sm:$0xff]  ;;  %s2748_s23 = sld [smem:[#allocation8_spill]] }
  0x12   :  { %v1923_v16 = vpack.c.bf16 %v294_v15, %v291_v14  ;;  %v127_v32 = vadd.s32 8, %v2244_v10  ;;  %v128_v33 = vadd.s32 16, %v2244_v10  ;;  %v129_v34 = vadd.s32 24, %v2244_v10  ;;  %v289_v40 = vld [vmem:[%s2719_s5] sm:$0xff]  ;;  %v292_v42 = vld [vmem:[%s2719_s5 + $0x18] sm:$0xff]  ;;  %v295_v1 = vld [vmem:[%s2719_s5 + $0x30] sm:$0xff] }
  0x13   :  { %v1919_v41 = vpack.c.bf16 %v293_v39, %v290_v38  ;;  %v1921_v43 = vpack.c.bf16 %v292_v42, %v289_v40  ;;  %v296_v44 = vld [vmem:[%s2719_s5 + $0x38] sm:$0xff]  ;;  %s2111_s5 = smov 32  }
  0x14   :  { %v2249_v11 = vld [vmem:[%s2745_s25] ss:$0 sm:$0xff]  ;;  %1924 = vmatprep.subr.bf16.mxu1 %v1923_v16 }
  0x15   :  { %93 = vperm.xlu1 %2071, %v71_v5   ;;  %90 = vperm.xlu0 %2070, %v70_v6   ;;  %vm134_vm0 = vcmp.eq.s32.totalorder %v2244_v10, %v2249_v11  ;;  %v2264_v17 = vld [vmem:[%s2746_s29] sm:$0xff]  ;;  %v2274_v19 = vld [vmem:[%s2746_s29 + $0x8] sm:$0xff]  ;;  %v2279_v20 = vld [vmem:[%s2746_s29 + $0x10] sm:$0xff]  ;;  %vm135_vm15 = vcmp.eq.s32.totalorder %v127_v32, %v2249_v11 }
  0x16   :  { %v1512_v13 = vsel %vm134_vm0, 1.0, %v2109_v12  ;;  %1713 = vmatprep.mubr.msk.f32.mxu1 %vm298_vm2, %v2264_v17  ;;  %1926 = vmatpush3.bf16.msra.mxu1 %v1923_v16  ;;  %v2288_v21 = vld [vmem:[%s2746_s29 + $0x18] sm:$0xff]  ;;  %vm136_vm0 = vcmp.eq.s32.totalorder %v128_v33, %v2249_v11  ;;  %v1513_v35 = vsel %vm135_vm15, 1.0, %v2109_v12  ;;  %v597_v6 = vld [vmem:[%s2721_s7] sm:$0xff]  ;;  %v1008_v38 = vld [vmem:[%s2747_s26 + $0x48] sm:$0xff] }
  0x17   :  { %1701 = vmatprep.mubr.msk.f32.mxu0 %vm146_vm1, %v1512_v13  ;;  %1711 = vmatprep.subr.mxu1 %v297_v18  ;;  %v1514_v36 = vsel %vm136_vm0, 1.0, %v2109_v12  ;;  %v1012_v39 = vld [vmem:[%s2747_s26 + $0x68] sm:$0xff] }
  0x19   :  { %99 = vperm.xlu1 %2071, %v73_v7   ;;  %96 = vperm.xlu0 %2070, %v72_v8   ;;  %v598_v7 = vld [vmem:[%s2721_s7 + $0x8] sm:$0xff] }
  0x1a   :  { %1712 = vmatpush3.msra.mxu1 %v297_v18  ;;  %v1935_v8 = vpack.c.bf16 %v598_v7, %v597_v6 }
  0x1b   :  { %1714 = vmatmul.mubr.msk.f32.vlgmr.msra.gmra.mrb[0].mxu1 %vm298_vm2, %v2274_v19 }
  0x1c   :  { %1716 = vmatprep.mubr.msk.f32.mxu1 %vm298_vm2, %v2279_v20  ;;  %1936 = vmatprep.subr.bf16.mxu1 %v1935_v8 }
  0x1d   :  { %1938 = vmatpush3.bf16.msra.mxu1 %v1935_v8 }
  0x1f   :  { %1717 = vmatmul.mubr.msk.f32.gmra.mrb[2].mxu1 %vm298_vm2, %v2288_v21 }
  0x8c   :  { %v85_v22 = vpop.permute.xlu1 %84  ;;  %v79_v23 = vpop.permute.xlu0 %78 }
  0x8d   :  { %vm103_vm4 = vcmp.eq.s32.totalorder %v2292_v24, %v85_v22  ;;  %vm101_vm5 = vcmp.eq.s32.totalorder %v2292_v24, %v79_v23 }
  0x90   :  { %v88_v25 = vpop.permute.xlu1 %87  ;;  %v82_v26 = vpop.permute.xlu0 %81 }
  0x91   :  { %vm102_vm3 = vcmp.eq.s32.totalorder %v2292_v24, %v82_v26  ;;  %vm104_vm6 = vcmp.eq.s32.totalorder %v2292_v24, %v88_v25 }
  0x92   :  { %vm1903_vm7 = vmpackc.low %vm102_vm3, %vm101_vm5  ;;  %vm137_vm3 = vcmp.eq.s32.totalorder %v129_v34, %v2249_v11  ;;  %vm244_vm5 = vcmp.eq.s32.totalorder %v2244_v10, %v2292_v24 }
  0x93   :  { %1904 = vmatprep.subr.msk.bf16.mxu0 %vm1903_vm7, %v2110_v27  ;;  %vm1907_vm8 = vmpackc.low %vm104_vm6, %vm103_vm4  ;;  %v1515_v37 = vsel %vm137_vm3, 1.0, %v2109_v12  ;;  %vm245_vm4 = vcmp.eq.s32.totalorder %v127_v32, %v2292_v24  ;;  %v1528_v49 = vsel %vm244_vm5, 1.0, %v2109_v12  ;;  %vm264_vm6 = vcmask 261120   ;;  %v999_v32 = vld [vmem:[%s2747_s26] sm:$0xff] }
  0x94   :  { %v94_v28 = vpop.permute.xlu1 %93  ;;  %v91_v29 = vpop.permute.xlu0 %90  ;;  %1906 = vmatpush3.bf16.msk.msra.mxu0 %vm1903_vm7, %v2110_v27  ;;  %v1529_v46 = vsel %vm245_vm4, 1.0, %v2109_v12  ;;  %vm246_vm7 = vcmp.eq.s32.totalorder %v128_v33, %v2292_v24  ;;  %v1003_v33 = vld [vmem:[%s2747_s26 + $0x20] sm:$0xff] }
  0x95   :  { %vm106_vm9 = vcmp.eq.s32.totalorder %v2292_v24, %v94_v28  ;;  %vm105_vm10 = vcmp.eq.s32.totalorder %v2292_v24, %v91_v29  ;;  %1908 = vmatprep.subr.msk.bf16.mxu0 %vm1907_vm8, %v2110_v27  ;;  %v1530_v56 = vsel %vm246_vm7, 1.0, %v2109_v12 }
  0x96   :  { %vm1911_vm11 = vmpackc.low %vm106_vm9, %vm105_vm10 }
  0x98   :  { %v100_v30 = vpop.permute.xlu1 %99  ;;  %v97_v31 = vpop.permute.xlu0 %96  ;;  %1910 = vmatpush3.bf16.msk.msra.mxu0 %vm1907_vm8, %v2110_v27  ;;  %vm247_vm8 = vcmp.eq.s32.totalorder %v129_v34, %v2292_v24  ;;  %v1007_v34 = vld [vmem:[%s2747_s26 + $0x40] sm:$0xff] }
  0x99   :  { %vm108_vm12 = vcmp.eq.s32.totalorder %v2292_v24, %v100_v30  ;;  %vm107_vm13 = vcmp.eq.s32.totalorder %v2292_v24, %v97_v31  ;;  %1912 = vmatprep.subr.msk.bf16.mxu0 %vm1911_vm11, %v2110_v27  ;;  %v1531_v60 = vsel %vm247_vm8, 1.0, %v2109_v12 }
  0x9a   :  { %vm1915_vm14 = vmpackc.low %vm108_vm12, %vm107_vm13 }
  0x9c   :  { %1914 = vmatpush3.bf16.msk.msra.mxu0 %vm1911_vm11, %v2110_v27 }
  0x9d   :  { %1916 = vmatprep.subr.msk.bf16.mxu0 %vm1915_vm14, %v2110_v27 }
  0xa0   :  { %1918 = vmatpush3.bf16.msk.msra.mxu0 %vm1915_vm14, %v2110_v27 }
  0xa1   :  { %1920 = vmatprep.subr.bf16.mxu0 %v1919_v41 }
  0xa3   :  { %1702 = vmatmul.mubr.msk.f32.vlgmr.msra.gmra.mrb[0].mxu0 %vm146_vm1, %v1513_v35  ;;  %v1011_v35 = vld [vmem:[%s2747_s26 + $0x60] sm:$0xff] }
  0xa4   :  { %1704 = vmatprep.mubr.msk.f32.mxu0 %vm146_vm1, %v1514_v36  ;;  %1922 = vmatpush1.bf16.msra.mxu0 %v1921_v43  ;;  %v1000_v36 = vld [vmem:[%s2747_s26 + $0x8] sm:$0xff] }
  0xa5   :  { %315 = vmatprep.subr.mxu0 %v296_v44 }
  0xa7   :  { %1705 = vmatmul.mubr.msk.f32.gmra.mrb[2].mxu0 %vm146_vm1, %v1515_v37  ;;  %v1004_v37 = vld [vmem:[%s2747_s26 + $0x28] sm:$0xff] }
  0xa8   :  { %375 = vmatprep.mubr.f32.mxu0 %v2109_v12  ;;  %316 = vmatpush1.msra.mxu0 %v295_v1 }
  0xab   :  { %1532 = vmatmul.mubr.msk.f32.vlgmr.msra.gmra.mrb[4].mxu0 %vm298_vm2, %v2264_v17 }
  0xac   :  { %381 = vmatprep.mubr.f32.mxu0 %v2109_v12 }
  0xaf   :  { %1533 = vmatmul.mubr.msk.f32.gmra.mrb[6].mxu0 %vm298_vm2, %v2274_v19 }
  0xb0   :  { %387 = vmatprep.mubr.f32.mxu0 %v2109_v12 }
  0xb3   :  { %1534 = vmatmul.mubr.msk.f32.gmra.mrb[8].mxu0 %vm298_vm2, %v2279_v20 }
  0xb4   :  { %393 = vmatprep.mubr.f32.mxu0 %v2109_v12 }
  0xb7   :  { %1535 = vmatmul.mubr.msk.f32.gmra.mrb[10].mxu0 %vm298_vm2, %v2288_v21 }
  0xee   :  { %v1715_v2 = vpop.f32.mrb[0].mxu1 }
  0xef   :  { %v466_v3 = vpop.f32.mrb[1].mxu1 }
  0xf2   :  { %v1718_v4 = vpop.f32.mrb[2].mxu1 }
  0xf3   :  { %v476_v5 = vpop.f32.mrb[3].mxu1 }
 0x176   :  { %v1703_v45 = vpop.f32.mrb[0].mxu0 }
 0x177   :  { %v257_v47 = vmin.f32 %v1703_v45, 1.0  ;;  %v225_v48 = vpop.f32.mrb[1].mxu0 }
 0x178   :  { %v256_v50 = vmin.f32 %v225_v48, 1.0 }
 0x179   :  { %v261_v51 = vadd.f32 %v1529_v46, %v257_v47 }
 0x17a   :  { %v1706_v52 = vpop.f32.mrb[2].mxu0  ;;  %v260_v53 = vadd.f32 %v1528_v49, %v256_v50 }
 0x17b   :  { %v235_v54 = vpop.f32.mrb[3].mxu0  ;;  %v268_v55 = vsel %vm264_vm6, %v261_v51, 0.0  ;;  %v259_v57 = vmin.f32 %v1706_v52, 1.0  ;;  %v1001_v52 = vld [vmem:[%s2747_s26 + $0x10] sm:$0xff] }
 0x17c   :  { %v258_v58 = vmin.f32 %v235_v54, 1.0  ;;  %269 = vadd.xlane.f32.xlu1 %v268_v55  ;;  %v265_v59 = vsel %vm264_vm6, %v260_v53, 0.0  ;;  %v1009_v54 = vld [vmem:[%s2747_s26 + $0x50] sm:$0xff] }
 0x17d   :  { %266 = vadd.xlane.f32.xlu0 %v265_v59  ;;  %v263_v63 = vadd.f32 %v1531_v60, %v259_v57  ;;  %v1013_v55 = vld [vmem:[%s2747_s26 + $0x70] sm:$0xff] }
 0x17e   :  { %v262_v61 = vadd.f32 %v1530_v56, %v258_v58  ;;  %v377_v28 = vpop.f32.mrb[4].mxu0  ;;  %v1002_v56 = vld [vmem:[%s2747_s26 + $0x18] sm:$0xff] }
 0x17f   :  { %v274_v0 = vsel %vm264_vm6, %v263_v63, 0.0  ;;  %v2397_v29 = vpop.f32.mrb[5].mxu0  ;;  %v1015_v42 = vmul.f32 %v999_v32, %v377_v28  ;;  %v1019_v43 = vmul.f32 %v1003_v33, %v377_v28  ;;  %v1023_v44 = vmul.f32 %v1007_v34, %v377_v28  ;;  %v800_v34 = vld [vmem:[%s2723_s9 + $0x10] sm:$0xff] }
 0x180   :  { %v271_v62 = vsel %vm264_vm6, %v262_v61, 0.0  ;;  %v1027_v45 = vmul.f32 %v1011_v35, %v377_v28  ;;  %v801_v35 = vld [vmem:[%s2723_s9 + $0x18] sm:$0xff] }
 0x181   :  { %272 = vadd.xlane.f32.xlu0 %v271_v62  ;;  %v1010_v62 = vld [vmem:[%s2747_s26 + $0x58] sm:$0xff] }
 0x182   :  { %v383_v30 = vpop.f32.mrb[6].mxu0 }
 0x183   :  { %v2399_v31 = vpop.f32.mrb[7].mxu0  ;;  %v1016_v46 = vmul.f32 %v1000_v36, %v383_v30  ;;  %v1020_v47 = vmul.f32 %v1004_v37, %v383_v30  ;;  %v1024_v48 = vmul.f32 %v1008_v38, %v383_v30  ;;  %v1028_v49 = vmul.f32 %v1012_v39, %v383_v30 }
 0x185   :  { %275 = vadd.xlane.f32.xlu0 %v274_v0  ;;  %v2444_v57 = vpack.c.bf16 %v1016_v46, %v1015_v42  ;;  %v2446_v58 = vpack.c.bf16 %v1020_v47, %v1019_v43  ;;  %v2448_v59 = vpack.c.bf16 %v1024_v48, %v1023_v44  ;;  %v2450_v60 = vpack.c.bf16 %v1028_v49, %v1027_v45 }
 0x186   :  { %v389_v40 = vpop.f32.mrb[8].mxu0  ;;  %v1955_v42 = vpack.c.bf16 %v801_v35, %v800_v34  ;;  %v1195_v35 = vld [vmem:[%s2728_s14 + $0x30] sm:$0xff] }
 0x187   :  { %v2425_v41 = vpop.f32.mrb[9].mxu0  ;;  %v1017_v0 = vmul.f32 %v1001_v52, %v389_v40 }
 0x18a   :  { %v395_v50 = vpop.f32.mrb[10].mxu0 }
 0x18b   :  { %v1026_v6 = vmul.f32 %v1010_v62, %v395_v50 }
 0x209   :  { %v270_v9 = vpop.xlane.xlu1 %269 }
 0x20a   :  { %2072 = vrsqrt.f32 %v270_v9  ;;  %v267_v11 = vpop.xlane.xlu0 %266 }
 0x20b   :  { %2074 = vrsqrt.f32 %v267_v11 }
 0x20e   :  { %v273_v12 = vpop.xlane.xlu0 %272 }
 0x20f   :  { %2076 = vrsqrt.f32 %v273_v12 }
 0x212   :  { %v276_v13 = vpop.xlane.xlu0 %275 }
 0x213   :  { %2078 = vrsqrt.f32 %v276_v13  ;;  %v599_v13 = vld [vmem:[%s2721_s7 + $0x10] sm:$0xff] }
 0x214   :  { %v2363_v14 = vpop.eup %2072 }
 0x215   :  { %v2365_v15 = vpop.eup %2074  ;;  %v486_v16 = vmul.f32 %v2363_v14, %v1715_v2  ;;  %v2381_v25 = vmul.f32 %v2363_v14, %v261_v51  ;;  %v2427_v51 = vpop.f32.mrb[11].mxu0  ;;  %v1025_v2 = vmul.f32 %v1009_v54, %v389_v40 }
 0x216   :  { %v485_v17 = vmul.f32 %v2365_v15, %v466_v3  ;;  %v2370_v18 = vmul.f32 %v2365_v15, %v260_v53  ;;  %v1005_v53 = vld [vmem:[%s2747_s26 + $0x30] sm:$0xff]  ;;  %v1029_v3 = vmul.f32 %v1013_v55, %v389_v40 }
 0x217   :  { %v1021_v1 = vmul.f32 %v1005_v53, %v389_v40  ;;  %v2465_v11 = vpack.c.bf16 %v1026_v6, %v1025_v2 }
 0x218   :  { %v1927_v19 = vpack.c.bf16 %v486_v16, %v485_v17  ;;  %1727 = vmatprep.mubr.msk.f32.mxu0 %vm264_vm6, %v2370_v18  ;;  %v600_v16 = vld [vmem:[%s2721_s7 + $0x18] sm:$0xff] }
 0x219   :  { %v2374_v20 = vpop.eup %2076  ;;  %v1939_v17 = vpack.c.bf16 %v600_v16, %v599_v13  ;;  %v1031_v16 = vld [vmem:[%s2748_s23] sm:$0xff] }
 0x21a   :  { %1928 = vmatprep.subr.bf16.mxu0 %v1927_v19  ;;  %v487_v23 = vmul.f32 %v2374_v20, %v476_v5  ;;  %v2384_v26 = vmul.f32 %v2374_v20, %v262_v61  ;;  %v1006_v61 = vld [vmem:[%s2747_s26 + $0x38] sm:$0xff] }
 0x21b   :  { %1930 = vmatpush3.bf16.msra.mxu0 %v1927_v19  ;;  %v1022_v5 = vmul.f32 %v1006_v61, %v395_v50  ;;  %1940 = vmatprep.subr.bf16.mxu1 %v1939_v17  ;;  %v798_v19 = vld [vmem:[%s2723_s9] sm:$0xff] }
 0x21c   :  { %1942 = vmatpush3.bf16.msra.mxu1 %v1939_v17  ;;  %v1549_v61 = vld [vmem:[%s2722_s8] ss:$0 sm:$0xff] }
 0x21d   :  { %v2376_v21 = vpop.eup %2078  ;;  %v2463_v9 = vpack.c.bf16 %v1022_v5, %v1021_v1 }
 0x21e   :  { %v488_v22 = vmul.f32 %v2376_v21, %v1718_v4  ;;  %v2391_v27 = vmul.f32 %v2376_v21, %v263_v63  ;;  %v1014_v63 = vld [vmem:[%s2747_s26 + $0x78] sm:$0xff]  ;;  %v1018_v4 = vmul.f32 %v1002_v56, %v395_v50 }
 0x21f   :  { %v1030_v7 = vmul.f32 %v1014_v63, %v395_v50 }
 0x220   :  { %v1931_v24 = vpack.c.bf16 %v488_v22, %v487_v23  ;;  %v2461_v8 = vpack.c.bf16 %v1018_v4, %v1017_v0  ;;  %v799_v22 = vld [vmem:[%s2723_s9 + $0x8] sm:$0xff] }
 0x221   :  { %v2467_v12 = vpack.c.bf16 %v1030_v7, %v1029_v3  ;;  %v1951_v23 = vpack.c.bf16 %v799_v22, %v798_v19 }
 0x222   :  { %1932 = vmatprep.subr.bf16.mxu0 %v1931_v24 }
 0x223   :  { %1934 = vmatpush3.bf16.msra.mxu0 %v1931_v24  ;;  %1952 = vmatprep.subr.bf16.mxu1 %v1951_v23  ;;  %v1540_v24 = vld [vmem:[%s2720_s6] ss:$0 sm:$0xff] }
 0x226   :  { %1728 = vmatmul.mubr.msk.f32.vlgmr.msra.gmra.mrb[12].mxu0 %vm264_vm6, %v2381_v25 }
 0x227   :  { %1730 = vmatprep.mubr.msk.f32.mxu0 %vm264_vm6, %v2384_v26 }
 0x22a   :  { %1731 = vmatmul.mubr.msk.f32.gmra.mrb[14].mxu0 %vm264_vm6, %v2391_v27 }
 0x22b   :  { %1755 = vmatprep.mubr.msk.f32.mxu0 %vm264_vm6, %v2370_v18 }
 0x2f9   :  { %v1729_v28 = vpop.f32.mrb[12].mxu0 }
 0x2fa   :  { %v580_v30 = vadd.f32 %v1729_v28, %v1540_v24  ;;  %v574_v32 = vpop.f32.mrb[13].mxu0 }
 0x2fb   :  { %v575_v33 = vadd.f32 %v1540_v24, %v574_v32 }
 0x2fc   :  { %v594_v38 = vmax.f32 %v580_v30, 0.0 }
 0x2fd   :  { %v593_v36 = vmax.f32 %v575_v33, 0.0  ;;  %v1732_v37 = vpop.f32.mrb[14].mxu0  ;;  %v1194_v33 = vld [vmem:[%s2728_s14 + $0x28] sm:$0xff] }
 0x2fe   :  { %v590_v39 = vadd.f32 %v1732_v37, %v1540_v24  ;;  %v584_v40 = vpop.f32.mrb[15].mxu0  ;;  %v1198_v37 = vld [vmem:[%s2728_s14 + $0x48] sm:$0xff] }
 0x2ff   :  { %v585_v43 = vadd.f32 %v1540_v24, %v584_v40  ;;  %1741 = vmatprep.mubr.msk.f32.mxu1 %vm264_vm6, %v593_v36  ;;  %v1190_v24 = vld [vmem:[%s2728_s14 + $0x8] sm:$0xff]  ;;  %v1196_v36 = vld [vmem:[%s2728_s14 + $0x38] sm:$0xff] }
 0x300   :  { %1742 = vmatmul.mubr.msk.f32.vlgmr.msra.gmra.mrb[4].mxu1 %vm264_vm6, %v594_v38  ;;  %v596_v45 = vmax.f32 %v590_v39, 0.0  ;;  %v1199_v39 = vld [vmem:[%s2728_s14 + $0x50] sm:$0xff] }
 0x301   :  { %v595_v44 = vmax.f32 %v585_v43, 0.0  ;;  %1954 = vmatpush3.bf16.msra.mxu1 %v1951_v23  ;;  %v1189_v23 = vld [vmem:[%s2728_s14] sm:$0xff]  ;;  %v1202_v43 = vld [vmem:[%s2728_s14 + $0x68] sm:$0xff] }
 0x302   :  { %1956 = vmatprep.subr.bf16.mxu1 %v1955_v42  ;;  %v1999_v30 = vpack.c.bf16 %v1190_v24, %v1189_v23 }
 0x303   :  { %1744 = vmatprep.mubr.msk.f32.mxu1 %vm264_vm6, %v595_v44 }
 0x304   :  { %1745 = vmatmul.mubr.msk.f32.gmra.mrb[6].mxu1 %vm264_vm6, %v596_v45  ;;  %v1563_v45 = vld [vmem:[%s2725_s11] ss:$0 sm:$0xff] }
 0x305   :  { %1958 = vmatpush3.bf16.msra.mxu1 %v1955_v42  ;;  %v1201_v42 = vld [vmem:[%s2728_s14 + $0x60] sm:$0xff] }
 0x306   :  { %1968 = vmatprep.subr.bf16.mxu1 %v2444_v57 }
 0x3d3   :  { %v1743_v46 = vpop.f32.mrb[4].mxu1 }
 0x3d4   :  { %v699_v47 = vmul.f32 %v2363_v14, %v1743_v46  ;;  %v679_v48 = vpop.f32.mrb[5].mxu1  ;;  %v2023_v46 = vpack.c.bf16 %v1202_v43, %v1201_v42 }
 0x3d5   :  { %v698_v49 = vmul.f32 %v2365_v15, %v679_v48 }
 0x3d7   :  { %v1943_v50 = vpack.c.bf16 %v699_v47, %v698_v49  ;;  %v1746_v52 = vpop.f32.mrb[6].mxu1  ;;  %v1203_v49 = vld [vmem:[%s2728_s14 + $0x70] sm:$0xff] }
 0x3d8   :  { %v701_v53 = vmul.f32 %v2376_v21, %v1746_v52  ;;  %v689_v54 = vpop.f32.mrb[7].mxu1 }
 0x3d9   :  { %v700_v55 = vmul.f32 %v2374_v20, %v689_v54  ;;  %1944 = vmatprep.subr.bf16.mxu0 %v1943_v50 }
 0x3da   :  { %1946 = vmatpush3.bf16.msra.mxu0 %v1943_v50  ;;  %v1204_v50 = vld [vmem:[%s2728_s14 + $0x78] sm:$0xff] }
 0x3db   :  { %v1947_v56 = vpack.c.bf16 %v701_v53, %v700_v55 }
 0x3dd   :  { %1948 = vmatprep.subr.bf16.mxu0 %v1947_v56 }
 0x3de   :  { %1950 = vmatpush3.bf16.msra.mxu0 %v1947_v56  ;;  %v2027_v56 = vpack.c.bf16 %v1204_v50, %v1203_v49  ;;  %v1357_v49 = vld [vmem:[%s2732_s18 + $0x10] sm:$0xff]  ;;  %v1358_v50 = vld [vmem:[%s2732_s18 + $0x18] sm:$0xff] }
 0x3e1   :  { %1756 = vmatmul.mubr.msk.f32.vlgmr.msra.gmra.mrb[16].mxu0 %vm264_vm6, %v2381_v25 }
 0x3e2   :  { %1758 = vmatprep.mubr.msk.f32.mxu0 %vm264_vm6, %v2384_v26 }
 0x3e5   :  { %1759 = vmatmul.mubr.msk.f32.gmra.mrb[18].mxu0 %vm264_vm6, %v2391_v27 }
 0x3e6   :  { %1783 = vmatprep.mubr.msk.f32.mxu0 %vm264_vm6, %v2370_v18 }
 0x4b4   :  { %v1757_v62 = vpop.f32.mrb[16].mxu0 }
 0x4b5   :  { %v781_v63 = vadd.f32 %v1757_v62, %v1549_v61  ;;  %v775_v0 = vpop.f32.mrb[17].mxu0 }
 0x4b6   :  { %v776_v1 = vadd.f32 %v1549_v61, %v775_v0 }
 0x4b7   :  { %v795_v4 = vmax.f32 %v781_v63, 0.0 }
 0x4b8   :  { %v794_v2 = vmax.f32 %v776_v1, 0.0  ;;  %v1760_v3 = vpop.f32.mrb[18].mxu0 }
 0x4b9   :  { %v791_v5 = vadd.f32 %v1760_v3, %v1549_v61  ;;  %v785_v6 = vpop.f32.mrb[19].mxu0 }
 0x4ba   :  { %v786_v7 = vadd.f32 %v1549_v61, %v785_v6  ;;  %1769 = vmatprep.mubr.msk.f32.mxu1 %vm264_vm6, %v794_v2 }
 0x4bb   :  { %1770 = vmatmul.mubr.msk.f32.vlgmr.msra.gmra.mrb[8].mxu1 %vm264_vm6, %v795_v4  ;;  %v797_v18 = vmax.f32 %v791_v5, 0.0 }
 0x4bc   :  { %v796_v13 = vmax.f32 %v786_v7, 0.0  ;;  %1970 = vmatpush3.bf16.msra.mxu1 %v2444_v57  ;;  %v1032_v57 = vld [vmem:[%s2748_s23 + $0x8] sm:$0xff] }
 0x4bd   :  { %1972 = vmatprep.subr.bf16.mxu1 %v2461_v8 }
 0x4be   :  { %1772 = vmatprep.mubr.msk.f32.mxu1 %vm264_vm6, %v796_v13 }
 0x4bf   :  { %1773 = vmatmul.mubr.msk.f32.gmra.mrb[10].mxu1 %vm264_vm6, %v797_v18 }
 0x4c0   :  { %1974 = vmatpush3.bf16.msra.mxu1 %v2461_v8  ;;  %1821 = vmatprep.mubr.f32.mxu1 %v1031_v16 }
 0x4c1   :  { %1976 = vmatprep.subr.bf16.mxu1 %v2446_v58 }
 0x4c4   :  { %1978 = vmatpush3.bf16.msra.mxu1 %v2446_v58  ;;  %v1033_v58 = vld [vmem:[%s2748_s23 + $0x10] sm:$0xff] }
 0x4c5   :  { %1980 = vmatprep.subr.bf16.mxu1 %v2463_v9 }
 0x4c8   :  { %1982 = vmatpush3.bf16.msra.mxu1 %v2463_v9 }
 0x4c9   :  { %1984 = vmatprep.subr.bf16.mxu1 %v2448_v59 }
 0x4cc   :  { %1986 = vmatpush3.bf16.msra.mxu1 %v2448_v59  ;;  %v1034_v59 = vld [vmem:[%s2748_s23 + $0x18] sm:$0xff] }
 0x4cd   :  { %1988 = vmatprep.subr.bf16.mxu1 %v2465_v11 }
 0x4d0   :  { %1990 = vmatpush3.bf16.msra.mxu1 %v2465_v11 }
 0x4d1   :  { %1992 = vmatprep.subr.bf16.mxu1 %v2450_v60 }
 0x4d4   :  { %1994 = vmatpush3.bf16.msra.mxu1 %v2450_v60 }
 0x4d5   :  { %1996 = vmatprep.subr.bf16.mxu1 %v2467_v12 }
 0x4d8   :  { %1998 = vmatpush3.bf16.msra.mxu1 %v2467_v12 }
 0x4db   :  { %1822 = vmatmul.mubr.f32.vlgmr.msra.gmra.mrb[12].mxu1 %v1032_v57 }
 0x4dc   :  { %1824 = vmatprep.mubr.f32.mxu1 %v1033_v58 }
 0x4df   :  { %1825 = vmatmul.mubr.f32.gmra.mrb[14].mxu1 %v1034_v59 }
 0x58e   :  { %v1771_v60 = vpop.f32.mrb[8].mxu1 }
 0x58f   :  { %v900_v8 = vmul.f32 %v2363_v14, %v1771_v60  ;;  %v880_v9 = vpop.f32.mrb[9].mxu1 }
 0x590   :  { %v899_v11 = vmul.f32 %v2365_v15, %v880_v9  ;;  %v1191_v15 = vld [vmem:[%s2728_s14 + $0x10] sm:$0xff] }
 0x592   :  { %v1959_v12 = vpack.c.bf16 %v900_v8, %v899_v11  ;;  %v1774_v17 = vpop.f32.mrb[10].mxu1 }
 0x593   :  { %v902_v19 = vmul.f32 %v2376_v21, %v1774_v17  ;;  %v890_v22 = vpop.f32.mrb[11].mxu1  ;;  %v1192_v21 = vld [vmem:[%s2728_s14 + $0x18] sm:$0xff] }
 0x594   :  { %v901_v28 = vmul.f32 %v2374_v20, %v890_v22  ;;  %1960 = vmatprep.subr.bf16.mxu0 %v1959_v12  ;;  %v2003_v32 = vpack.c.bf16 %v1192_v21, %v1191_v15  ;;  %v1193_v20 = vld [vmem:[%s2728_s14 + $0x20] sm:$0xff]  ;;  %v2610_v15 = vsub.s32 0, %v2244_v10 }
 0x595   :  { %1962 = vmatpush3.bf16.msra.mxu0 %v1959_v12  ;;  %v2007_v34 = vpack.c.bf16 %v1194_v33, %v1193_v20  ;;  %v1132_v20 = vld [vmem:[%s2727_s13] sm:$0x1] }
 0x596   :  { %v1963_v14 = vpack.c.bf16 %v902_v19, %v901_v28 }
 0x598   :  { %1964 = vmatprep.subr.bf16.mxu0 %v1963_v14 }
 0x599   :  { %1966 = vmatpush3.bf16.msra.mxu0 %v1963_v14 }
 0x59a   :  { %2000 = vmatprep.subr.bf16.mxu0 %v1999_v30 }
 0x59c   :  { %1784 = vmatmul.mubr.msk.f32.vlgmr.msra.gmra.mrb[20].mxu0 %vm264_vm6, %v2381_v25  ;;  %v2011_v25 = vpack.c.bf16 %v1196_v36, %v1195_v35 }
 0x59d   :  { %1786 = vmatprep.mubr.msk.f32.mxu0 %vm264_vm6, %v2384_v26  ;;  %2002 = vmatpush3.bf16.msra.mxu0 %v1999_v30  ;;  %v1197_v26 = vld [vmem:[%s2728_s14 + $0x40] sm:$0xff] }
 0x59e   :  { %2004 = vmatprep.subr.bf16.mxu0 %v2003_v32  ;;  %v2015_v38 = vpack.c.bf16 %v1198_v37, %v1197_v26  ;;  %v1131_v30 = vld [vmem:[%s2726_s12] sm:$0x1] }
 0x5a0   :  { %1787 = vmatmul.mubr.msk.f32.gmra.mrb[22].mxu0 %vm264_vm6, %v2391_v27  ;;  %v1200_v27 = vld [vmem:[%s2728_s14 + $0x58] sm:$0xff] }
 0x5a1   :  { %2006 = vmatpush3.bf16.msra.mxu0 %v2003_v32  ;;  %v2019_v40 = vpack.c.bf16 %v1200_v27, %v1199_v39 }
 0x5a2   :  { %2008 = vmatprep.subr.bf16.mxu0 %v2007_v34 }
 0x5a5   :  { %2010 = vmatpush3.bf16.msra.mxu0 %v2007_v34 }
 0x5a6   :  { %2012 = vmatprep.subr.bf16.mxu0 %v2011_v25 }
 0x5a9   :  { %2014 = vmatpush3.bf16.msra.mxu0 %v2011_v25 }
 0x5aa   :  { %2016 = vmatprep.subr.bf16.mxu0 %v2015_v38 }
 0x5ad   :  { %2018 = vmatpush3.bf16.msra.mxu0 %v2015_v38 }
 0x5ae   :  { %v1823_v44 = vpop.f32.mrb[12].mxu1  ;;  %2020 = vmatprep.subr.bf16.mxu0 %v2019_v40 }
 0x5af   :  { %v1107_v47 = vadd.f32 %v1823_v44, %v2399_v31  ;;  %v1101_v48 = vpop.f32.mrb[13].mxu1 }
 0x5b0   :  { %v1102_v52 = vadd.f32 %v1101_v48, %v2397_v29 }
 0x5b1   :  { %v1128_v53 = vadd.f32 %v1563_v45, %v1107_v47  ;;  %2022 = vmatpush3.bf16.msra.mxu0 %v2019_v40  ;;  %v1356_v47 = vld [vmem:[%s2732_s18 + $0x8] sm:$0xff] }
 0x5b2   :  { %v1127_v54 = vadd.f32 %v1563_v45, %v1102_v52  ;;  %v1826_v55 = vpop.f32.mrb[14].mxu1  ;;  %2024 = vmatprep.subr.bf16.mxu0 %v2023_v46  ;;  %v2035_v52 = vpack.c.bf16 %v1358_v50, %v1357_v49 }
 0x5b3   :  { %v1144_v61 = vmul.f32 %v1128_v53, %v1128_v53  ;;  %v1117_v31 = vadd.f32 %v1826_v55, %v2427_v51  ;;  %v1111_v62 = vpop.f32.mrb[15].mxu1 }
 0x5b4   :  { %v1133_v63 = vadd.f32 %v1128_v53, %v1127_v54  ;;  %v1143_v0 = vmul.f32 %v1127_v54, %v1127_v54  ;;  %v1112_v1 = vadd.f32 %v1111_v62, %v2425_v41  ;;  %v1363_v62 = vld [vmem:[%s2732_s18 + $0x40] sm:$0xff] }
 0x5b5   :  { %2026 = vmatpush3.bf16.msra.mxu0 %v2023_v46  ;;  %v1130_v3 = vadd.f32 %v1563_v45, %v1117_v31  ;;  %v1355_v46 = vld [vmem:[%s2732_s18] sm:$0xff] }
 0x5b6   :  { %v1147_v2 = vadd.f32 %v1144_v61, %v1143_v0  ;;  %v1129_v4 = vadd.f32 %v1563_v45, %v1112_v1  ;;  %2028 = vmatprep.subr.bf16.mxu0 %v2027_v56  ;;  %v2031_v48 = vpack.c.bf16 %v1356_v47, %v1355_v46  ;;  %v1362_v61 = vld [vmem:[%s2732_s18 + $0x38] sm:$0xff]  ;;  %v1365_v1 = vld [vmem:[%s2732_s18 + $0x50] sm:$0xff] }
 0x5b7   :  { %v1146_v6 = vmul.f32 %v1130_v3, %v1130_v3 }
 0x5b8   :  { %v1134_v29 = vadd.f32 %v1133_v63, %v1129_v4  ;;  %v1145_v5 = vmul.f32 %v1129_v4, %v1129_v4  ;;  %2032 = vmatprep.subr.bf16.mxu1 %v2031_v48  ;;  %v1364_v63 = vld [vmem:[%s2732_s18 + $0x48] sm:$0xff] }
 0x5b9   :  { %2030 = vmatpush3.bf16.msra.mxu0 %v2027_v56  ;;  %2034 = vmatpush3.bf16.msra.mxu1 %v2031_v48  ;;  %v1361_v56 = vld [vmem:[%s2732_s18 + $0x30] sm:$0xff]  ;;  %v2047_v0 = vpack.c.bf16 %v1364_v63, %v1363_v62  ;;  %v1297_v48 = vld [vmem:[%s2730_s16] sm:$0x1] }
 0x5ba   :  { %v1135_v7 = vadd.f32 %v1134_v29, %v1130_v3  ;;  %v1148_v13 = vadd.f32 %v1147_v2, %v1145_v5  ;;  %2036 = vmatprep.subr.bf16.mxu1 %v2035_v52  ;;  %v2043_v31 = vpack.c.bf16 %v1362_v61, %v1361_v56  ;;  %v1366_v2 = vld [vmem:[%s2732_s18 + $0x58] sm:$0xff]  ;;  %v1368_v29 = vld [vmem:[%s2732_s18 + $0x68] sm:$0xff] }
 0x5bc   :  { %v1136_v18 = vrot.slane %v1135_v7, 4  ;;  %v1149_v16 = vadd.f32 %v1148_v13, %v1146_v6  ;;  %v1369_v6 = vld [vmem:[%s2732_s18 + $0x70] sm:$0xff] }
 0x5bd   :  { %2038 = vmatpush3.bf16.msra.mxu1 %v2035_v52  ;;  %v1298_v52 = vld [vmem:[%s2731_s17] sm:$0x1] }
 0x5be   :  { %v1137_v57 = vadd.f32 %v1136_v18, %v1135_v7  ;;  %v1150_v51 = vrot.slane %v1149_v16, 4  ;;  %v1370_v7 = vld [vmem:[%s2732_s18 + $0x78] sm:$0xff] }
 0x5bf   :  { %v2059_v18 = vpack.c.bf16 %v1370_v7, %v1369_v6  ;;  %v1565_v7 = vld [vmem:[%s2733_s19] ss:$0 sm:$0xff] }
 0x5c0   :  { %v1138_v58 = vrot.slane %v1137_v57, 2  ;;  %v1151_v59 = vadd.f32 %v1150_v51, %v1149_v16 }
 0x5c2   :  { %v1139_v60 = vadd.f32 %v1138_v58, %v1137_v57  ;;  %v1152_v8 = vrot.slane %v1151_v59, 2  ;;  %v1564_v58 = vld [vmem:[%s2729_s15] ss:$0 sm:$0xff] }
 0x5c4   :  { %v1140_v41 = vrot.slane %v1139_v60, 1  ;;  %v1153_v9 = vadd.f32 %v1152_v8, %v1151_v59 }
 0x5c6   :  { %v1141_v11 = vadd.f32 %v1140_v41, %v1139_v60  ;;  %v1154_v12 = vrot.slane %v1153_v9, 1 }
 0x5c8   :  { %v1142_v17 = vmul.f32 0.03125, %v1141_v11  ;;  %v1155_v19 = vadd.f32 %v1154_v12, %v1153_v9 }
 0x5ca   :  { %v1156_v22 = vmul.f32 0.03125, %v1155_v19  ;;  %v1157_v23 = vmul.f32 %v1142_v17, %v1142_v17 }
 0x5cc   :  { %v1158_v24 = vsub.f32 %v1156_v22, %v1157_v23 }
 0x5ce   :  { %v1159_v28 = vmax.f32 %v1158_v24, 0.0 }
 0x5d0   :  { %v1160_v14 = vadd.f32 1e-05, %v1159_v28 }
 0x5d2   :  { %2080 = vrsqrt.f32 %v1160_v14 }
 0x5dc   :  { %v2081_v21 = vpop.eup %2080 }
 0x5dd   :  { %v1162_v32 = vmul.f32 %v2081_v21, %v1131_v30 }
 0x5df   :  { %v1167_v33 = vrot.slane %v1162_v32, %v2610_v15  ;;  %v1173_v34 = vmul.f32 %v1162_v32, %v1142_v17 }
 0x5e1   :  { %v1169_v35 = vmul.f32 %v1167_v33, %v1127_v54  ;;  %v1174_v36 = vsub.f32 %v1132_v20, %v1173_v34  ;;  %v1170_v25 = vmul.f32 %v1167_v33, %v1128_v53  ;;  %v1171_v26 = vmul.f32 %v1167_v33, %v1129_v4  ;;  %v1359_v53 = vld [vmem:[%s2732_s18 + $0x20] sm:$0xff]  ;;  %v1360_v54 = vld [vmem:[%s2732_s18 + $0x28] sm:$0xff] }
 0x5e2   :  { %v1172_v37 = vmul.f32 %v1167_v33, %v1130_v3  ;;  %v2039_v55 = vpack.c.bf16 %v1360_v54, %v1359_v53  ;;  %v2051_v3 = vpack.c.bf16 %v1366_v2, %v1365_v1  ;;  %v1367_v4 = vld [vmem:[%s2732_s18 + $0x60] sm:$0xff] }
 0x5e3   :  { %v1179_v38 = vrot.slane %v1174_v36, %v2610_v15  ;;  %v2055_v5 = vpack.c.bf16 %v1368_v29, %v1367_v4 }
 0x5e4   :  { %2040 = vmatprep.subr.bf16.mxu1 %v2039_v55 }
 0x5e5   :  { %v1181_v39 = vadd.f32 %v1179_v38, %v1169_v35  ;;  %v1182_v27 = vadd.f32 %v1179_v38, %v1170_v25  ;;  %v1183_v10 = vadd.f32 %v1179_v38, %v1171_v26  ;;  %v1184_v40 = vadd.f32 %v1179_v38, %v1172_v37  ;;  %2042 = vmatpush3.bf16.msra.mxu1 %v2039_v55 }
 0x5e6   :  { %2044 = vmatprep.subr.bf16.mxu1 %v2043_v31 }
 0x5e7   :  { %v1185_v42 = vmax.f32 %v1181_v39, 0.0  ;;  %v1186_v43 = vmax.f32 %v1182_v27, 0.0  ;;  %v1187_v44 = vmax.f32 %v1183_v10, 0.0  ;;  %v1188_v45 = vmax.f32 %v1184_v40, 0.0 }
 0x5e9   :  { %1859 = vmatprep.mubr.f32.mxu0 %v1185_v42  ;;  %2046 = vmatpush3.bf16.msra.mxu1 %v2043_v31 }
 0x5ea   :  { %1860 = vmatmul.mubr.f32.vlgmr.msra.gmra.mrb[24].mxu0 %v1186_v43  ;;  %2048 = vmatprep.subr.bf16.mxu1 %v2047_v0 }
 0x5eb   :  { %1862 = vmatprep.mubr.f32.mxu0 %v1187_v44 }
 0x5ed   :  { %2050 = vmatpush3.bf16.msra.mxu1 %v2047_v0 }
 0x5ee   :  { %1863 = vmatmul.mubr.f32.gmra.mrb[26].mxu0 %v1188_v45  ;;  %2052 = vmatprep.subr.bf16.mxu1 %v2051_v3 }
 0x5f1   :  { %2054 = vmatpush3.bf16.msra.mxu1 %v2051_v3 }
 0x5f2   :  { %2056 = vmatprep.subr.bf16.mxu1 %v2055_v5 }
 0x5f5   :  { %2058 = vmatpush3.bf16.msra.mxu1 %v2055_v5 }
 0x5f6   :  { %2060 = vmatprep.subr.bf16.mxu1 %v2059_v18 }
 0x5f9   :  { %2062 = vmatpush3.bf16.msra.mxu1 %v2059_v18 }
 0x66f   :  { %v2665_v13 = vpop.f32.mrb[20].mxu0 }
 0x670   :  { %v2667_v16 = vpop.f32.mrb[21].mxu0 }
 0x673   :  { %v2669_v57 = vpop.f32.mrb[22].mxu0 }
 0x674   :  { %v2671_v51 = vpop.f32.mrb[23].mxu0 }
 0x6bd   :  { %v1861_v59 = vpop.f32.mrb[24].mxu0 }
 0x6be   :  { %v1284_v60 = vadd.f32 %v1861_v59, %v1564_v58  ;;  %v1278_v8 = vpop.f32.mrb[25].mxu0 }
 0x6bf   :  { %v1279_v41 = vadd.f32 %v1564_v58, %v1278_v8 }
 0x6c0   :  { %v1310_v9 = vmul.f32 %v1284_v60, %v1284_v60 }
 0x6c1   :  { %v1299_v11 = vadd.f32 %v1284_v60, %v1279_v41  ;;  %v1309_v12 = vmul.f32 %v1279_v41, %v1279_v41  ;;  %v1864_v17 = vpop.f32.mrb[26].mxu0 }
 0x6c2   :  { %v1288_v19 = vpop.f32.mrb[27].mxu0  ;;  %v1294_v23 = vadd.f32 %v1864_v17, %v1564_v58 }
 0x6c3   :  { %v1313_v22 = vadd.f32 %v1310_v9, %v1309_v12  ;;  %v1289_v24 = vadd.f32 %v1564_v58, %v1288_v19 }
 0x6c4   :  { %v1312_v30 = vmul.f32 %v1294_v23, %v1294_v23 }
 0x6c5   :  { %v1300_v28 = vadd.f32 %v1299_v11, %v1289_v24  ;;  %v1311_v14 = vmul.f32 %v1289_v24, %v1289_v24  ;;  %v1558_v11 = vld [vmem:[%s2724_s10] ss:$0 sm:$0xff]  ;;  %s2112_s10 = smov [#allocation2]  }
 0x6c6   :  { %v982_v12 = vadd.f32 %v2665_v13, %v1558_v11  ;;  %v977_v17 = vadd.f32 %v1558_v11, %v2667_v16  ;;  %s1492_s19 = sshll.u32 %s2112_s10, 4  ;;  %s1493_s19 = int_to_ptr.vmem [resolvable:$true] %s1492_s19 }
 0x6c7   :  { %v1301_v21 = vadd.f32 %v1300_v28, %v1294_v23  ;;  %v1314_v32 = vadd.f32 %v1313_v22, %v1311_v14  ;;  %s2084_s6 = scalar_lea.vmem %s1493_s19, 512  ;;  %p2089_p1 = scmp.lt.s32.totalorder %s1493_s19, %s1493_s19 }
 0x6c8   :  { %v996_v19 = vmax.f32 %v982_v12, 0.0  ;;  %v995_v22 = vmax.f32 %v977_v17, 0.0  ;;  %p2085_p0 = scmp.ne.s32.totalorder %s1493_s19, %s2084_s6  ;;  %p2090_p2 = scmp.lt.s32.totalorder %s2084_s6, %s2084_s6 }
 0x6c9   :  { %v1302_v20 = vrot.slane %v1301_v21, 4  ;;  %v1315_v33 = vadd.f32 %v1314_v32, %v1312_v30 }
 0x6ca   :  { %p2091_p3 = por %p2090_p2, %p2089_p1 }
 0x6cb   :  { %v1303_v34 = vadd.f32 %v1302_v20, %v1301_v21  ;;  %v1316_v35 = vrot.slane %v1315_v33, 4  ;;  %v992_v21 = vadd.f32 %v2669_v57, %v1558_v11 }
 0x6cc   :  { %p2092_p4 = pnand %p2091_p3, %p2085_p0 }
 0x6cd   :  { %v1304_v36 = vrot.slane %v1303_v34, 2  ;;  %v1317_v25 = vadd.f32 %v1316_v35, %v1315_v33 }
 0x6cf   :  { %v1305_v26 = vadd.f32 %v1304_v36, %v1303_v34  ;;  %v1318_v37 = vrot.slane %v1317_v25, 2 }
 0x6d1   :  { %v1306_v38 = vrot.slane %v1305_v26, 1  ;;  %v1319_v39 = vadd.f32 %v1318_v37, %v1317_v25 }
 0x6d3   :  { %v1307_v27 = vadd.f32 %v1306_v38, %v1305_v26  ;;  %v1320_v10 = vrot.slane %v1319_v39, 1 }
 0x6d5   :  { %v1308_v40 = vmul.f32 0.03125, %v1307_v27  ;;  %v1321_v42 = vadd.f32 %v1320_v10, %v1319_v39 }
 0x6d7   :  { %v1322_v43 = vmul.f32 0.03125, %v1321_v42  ;;  %v1323_v44 = vmul.f32 %v1308_v40, %v1308_v40 }
 0x6d9   :  { %v1324_v45 = vsub.f32 %v1322_v43, %v1323_v44 }
 0x6db   :  { %v1325_v46 = vmax.f32 %v1324_v45, 0.0 }
 0x6dd   :  { %v1326_v47 = vadd.f32 1e-05, %v1325_v46 }
 0x6df   :  { %2082 = vrsqrt.f32 %v1326_v47 }
 0x6e9   :  { %v2083_v49 = vpop.eup %2082 }
 0x6ea   :  { %v1328_v50 = vmul.f32 %v2083_v49, %v1297_v48 }
 0x6ec   :  { %v1333_v53 = vrot.slane %v1328_v50, %v2610_v15  ;;  %v1339_v54 = vmul.f32 %v1328_v50, %v1308_v40 }
 0x6ee   :  { %v1337_v55 = vmul.f32 %v1333_v53, %v1289_v24  ;;  %v1335_v56 = vmul.f32 %v1333_v53, %v1279_v41  ;;  %v1340_v61 = vsub.f32 %v1298_v52, %v1339_v54  ;;  %v1336_v31 = vmul.f32 %v1333_v53, %v1284_v60 }
 0x6ef   :  { %v1338_v62 = vmul.f32 %v1333_v53, %v1294_v23  ;;  %v987_v23 = vadd.f32 %v1558_v11, %v2671_v51  ;;  %v998_v51 = vmax.f32 %v992_v21, 0.0 }
 0x6f0   :  { %v1345_v63 = vrot.slane %v1340_v61, %v2610_v15 }
 0x6f1   :  { %v997_v32 = vmax.f32 %v987_v23, 0.0 }
 0x6f2   :  { %v1347_v0 = vadd.f32 %v1345_v63, %v1335_v56  ;;  %v1348_v1 = vadd.f32 %v1345_v63, %v1336_v31  ;;  %v1349_v2 = vadd.f32 %v1345_v63, %v1337_v55  ;;  %v1350_v3 = vadd.f32 %v1345_v63, %v1338_v62 }
 0x6f4   :  { %v1351_v4 = vmax.f32 %v1347_v0, 0.0  ;;  %v1352_v29 = vmax.f32 %v1348_v1, 0.0  ;;  %v1353_v5 = vmax.f32 %v1349_v2, 0.0  ;;  %v1354_v6 = vmax.f32 %v1350_v3, 0.0 }
 0x6f6   :  { %1897 = vmatprep.mubr.f32.mxu1 %v1351_v4 }
 0x6f7   :  { %1898 = vmatmul.mubr.f32.vlgmr.msra.gmra.mrb[16].mxu1 %v1352_v29 }
 0x6f8   :  { %1900 = vmatprep.mubr.f32.mxu1 %v1353_v5 }
 0x6fb   :  { %1901 = vmatmul.mubr.f32.gmra.mrb[18].mxu1 %v1354_v6 }
 0x7ca   :  { %v1899_v18 = vpop.f32.mrb[16].mxu1 }
 0x7cb   :  { %v1450_v58 = vadd.f32 %v1899_v18, %v1565_v7  ;;  %v1444_v59 = vpop.f32.mrb[17].mxu1 }
 0x7cc   :  { %v1445_v15 = vadd.f32 %v1565_v7, %v1444_v59 }
 0x7cd   :  { %1469 = vrot.lane.b32.xlu0 %v1450_v58, %s2111_s5 }
 0x7ce   :  { %v1902_v60 = vpop.f32.mrb[18].mxu1  ;;  %1467 = vrot.lane.b32.xlu1 %v1445_v15, %s2111_s5 }
 0x7cf   :  { %v1454_v8 = vpop.f32.mrb[19].mxu1  ;;  %v1460_v9 = vadd.f32 %v1902_v60, %v1565_v7 }
 0x7d0   :  { %v1455_v41 = vadd.f32 %v1565_v7, %v1454_v8 }
 0x7d2   :  { %1471 = vrot.lane.b32.xlu1 %v1455_v41, %s2111_s5 }
 0x7d6   :  { %1473 = vrot.lane.b32.xlu1 %v1460_v9, %s2111_s5 }
 0x83f   :  { %v1470_v24 = vpop.permute.xlu0 %1469 }
 0x840   :  { %v1480_v28 = vsel %vm264_vm6, %v996_v19, %v1470_v24  ;;  %v1468_v14 = vpop.permute.xlu1 %1467 }
 0x841   :  { %1484 = vst.msk [vmem:[#allocation2 + $0x8] sm:$0xff] %vm146_vm1, %v1480_v28  ;;  %v1479_v30 = vsel %vm264_vm6, %v995_v22, %v1468_v14 }
 0x842   :  { %1483 = vst.msk [vmem:[#allocation2] sm:$0xff] %vm146_vm1, %v1479_v30 }
 0x844   :  { %v1472_v13 = vpop.permute.xlu1 %1471 }
 0x845   :  { %v1481_v16 = vsel %vm264_vm6, %v997_v32, %v1472_v13 }
 0x846   :  { %1485 = vst.msk [vmem:[#allocation2 + $0x10] sm:$0xff] %vm146_vm1, %v1481_v16 }
 0x848   :  { %v1474_v20 = vpop.permute.xlu1 %1473 }
 0x849   :  { %v1482_v33 = vsel %vm264_vm6, %v998_v51, %v1474_v20 }
 0x84a   :  { %1486 = vst.msk [vmem:[#allocation2 + $0x18] sm:$0xff] %vm146_vm1, %v1482_v33 }
 0x84b   :  { %2095 = shalt.err (!%p2092_p4)
}
 0x84c   :  { %s2096_s25 = scalar_lea.hbm %s2734_s20, 512 }
 0x84d   :  { %p2097_p5 = scmp.ne.s32.totalorder %s2734_s20, %s2096_s25  ;;  %p2100_p6 = scmp.lt.u32.totalorder %s2096_s25, %s2734_s20 }
 0x84f   :  { %p2102_p7 = pnand %p2100_p6, %p2097_p5 }
 0x851   :  { %2105 = shalt.err (!%p2102_p7)
}
 0x852   :  { %s2113_s27 = smov 128   ;;  %s2114_s12 = smov 8  }
 0x853   :  { %1498 = dma.vmem_to_hbm [thread:$0]  %s1493_s19, 512, %s2734_s20, [#allocation3], %s2113_s27, %s2113_s27, %s2114_s12  }
 0x854   :  { %2106 = dma.done.wait [#allocation3], 512  }
 0x855   :  { %2107 = vsyncadd [#allocation3], 4294966784 }
 0x856   :  { %1502 = vsyncpa [#allocation3], 1 }

</bundles_post_ra>
